<compile_context>
chip_gen: v5e
topology: v5e:2x2
jax: 0.10.0
libtpu: 0.0.40
codegen_flags: <defaults>
</compile_context>

<pallas_src>
import math
import numpy as np
import jax
import jax.numpy as jnp
from jax.experimental import pallas as pl
from jax.experimental.pallas import tpu as pltpu


# ---------------------------------------------------------------------------
# Small helpers: padding + generation-aware tiling knobs
# ---------------------------------------------------------------------------
def _round_up(x, m):
    return ((x + m - 1) // m) * m


def _pad_to(x, shape):
    return jnp.pad(x, [(0, t - s) for s, t in zip(x.shape, shape)])


def _device_kind():
    try:
        d = jax.devices()[0]
        if d.platform == "tpu":
            return (getattr(d, "device_kind", "") or "").lower()
    except Exception:
        pass
    return ""


def _is_v7(kind):
    return any(t in kind for t in ("v7", "tpu7", "7x"))


def _num_tensorcores_per_chip():
    # v7x has 2 TensorCores per chip; v5e / v6e have 1.
    return 2 if _is_v7(_device_kind()) else 1


def _vmem_capacity_bytes():
    try:
        info = pltpu.get_tpu_info()
        for name in ("vmem_capacity_bytes", "vmem_bytes"):
            v = getattr(info, name, None)
            if v:
                return int(v)
    except Exception:
        pass
    return (64 if _is_v7(_device_kind()) else 128) * 1024 * 1024


def _vmem_limit_bytes():
    # 96 MiB on 128-MiB chips (v5e/v6e), ~48 MiB on v7x (64 MiB VMEM).
    return int(min(_vmem_capacity_bytes() * 3 // 4, 96 * 1024 * 1024))


def _pick_batch_tile(B, n_tc):
    # Single grid step on single-TensorCore chips (v5e/v6e); on v7x keep at
    # least n_tc grid steps so both TensorCores get work.
    if n_tc <= 1:
        return B
    for cand in range(B, 0, -1):
        if B % cand == 0 and B // cand >= n_tc:
            return cand
    return 1


def _gcn_row_tile(Np, Fp, vmem_limit):
    # Budget: adj row block (tm, Np) f32 + out block (tm, Fp) f32 (both
    # double-buffered) + resident bf16 xw (Np, Fp) + bias, under ~45% of the
    # per-call VMEM limit.
    budget = int(vmem_limit * 0.45)
    fixed = 2 * Np * Fp * 2 + Fp * 4
    per_row = 2 * (Np * 4 + Fp * 4)
    tm = (budget - fixed) // max(per_row, 1)
    tm = int(max(8, min(tm, Np, 1024)))
    tm = (tm // 8) * 8
    if tm >= Np:
        return Np
    # TODO(synk): if tm lands below ~512 for very large Np (v7x 64 MiB VMEM),
    # add a contraction ("arbitrary") grid axis over adjacency columns with a
    # VMEM accumulator instead of full-N-wide adjacency rows.
    return max(tm, 8)


# ---------------------------------------------------------------------------
# Kernel 1a: xw = x @ [Wk | Wv]   (computed ONCE, emitted as bf16)
# Kernel 1b: fused GCNConv propagate for K and V:
#            out = Adj_norm_rowtile @ xw + [bk | bv]
# ---------------------------------------------------------------------------
def _xw_kernel(x_ref, w_ref, o_ref):
    o_ref[...] = jnp.dot(
        x_ref[...].astype(jnp.bfloat16), w_ref[...].astype(jnp.bfloat16),
        preferred_element_type=jnp.float32).astype(jnp.bfloat16)


def _gcn_prop_kernel(adj_ref, xw_ref, b_ref, o_ref):
    o_ref[...] = jnp.dot(
        adj_ref[...].astype(jnp.bfloat16), xw_ref[...],
        preferred_element_type=jnp.float32) + b_ref[...]


def gcn_conv_fused(adj_norm, x, w_kv, b_kv):
    N = adj_norm.shape[0]
    K = x.shape[1]
    F2 = w_kv.shape[1]
    Np = _round_up(max(N, 8), 8)
    Kp = _round_up(K, 128)
    Fp = _round_up(F2, 128)

    adj_p = _pad_to(adj_norm, (Np, Np))
    x_p = _pad_to(x, (Np, Kp))
    w_p = _pad_to(w_kv, (Kp, Fp))
    b_p = _pad_to(b_kv.reshape(1, F2), (1, Fp))

    vmem_limit = _vmem_limit_bytes()

    # xw hoisted out of the row-tiled loop: one tiny matmul, bf16 output.
    xw = pl.pallas_call(
        _xw_kernel,
        out_shape=jax.ShapeDtypeStruct((Np, Fp), jnp.bfloat16),
        grid=(1,),
        in_specs=[pl.BlockSpec((Np, Kp), lambda i: (0, 0)),
                  pl.BlockSpec((Kp, Fp), lambda i: (0, 0))],
        out_specs=pl.BlockSpec((Np, Fp), lambda i: (0, 0)),
        compiler_params=pltpu.CompilerParams(vmem_limit_bytes=vmem_limit),
    )(x_p, w_p)

    tm = _gcn_row_tile(Np, Fp, vmem_limit)
    grid = (pl.cdiv(Np, tm),)
    out = pl.pallas_call(
        _gcn_prop_kernel,
        out_shape=jax.ShapeDtypeStruct((Np, Fp), jnp.float32),
        grid=grid,
        in_specs=[pl.BlockSpec((tm, Np), lambda i: (i, 0)),
                  pl.BlockSpec((Np, Fp), lambda i: (0, 0)),
                  pl.BlockSpec((1, Fp), lambda i: (0, 0))],
        out_specs=pl.BlockSpec((tm, Fp), lambda i: (i, 0)),
        compiler_params=pltpu.CompilerParams(
            dimension_semantics=("parallel",),
            vmem_limit_bytes=vmem_limit,
        ),
    )(adj_p, xw, b_p)
    return out[:N, :F2]


# ---------------------------------------------------------------------------
# Kernel 2: fused  fc_q -> multi-head masked attention (+Q residual) ->
#           head merge -> ln0 -> fc_o + ReLU residual -> ln1
# Everything lane-dense (feature dims padded to 128 lanes in the wrapper).
# ---------------------------------------------------------------------------
def _make_attn_kernel(num_heads, dim_V, ds_pad, eps=1e-5):
    H = num_heads
    ds = dim_V // H
    scale = 1.0 / math.sqrt(dim_V)
    bf16 = jnp.bfloat16

    def kernel(qr_ref, wq_ref, bq_ref, k_ref, v_ref, m_ref, eye_ref,
               wo_ref, bo_ref, g0_ref, b0_ref, g1_ref, b1_ref, o_ref):
        Bt, Nqp, Qp = qr_ref.shape
        Vp = o_ref.shape[-1]
        BN = Bt * Nqp

        # LayerNorm statistics must only see the true dim_V features; the
        # padded lanes of the merged slab are exactly zero by construction.
        lane_valid = (jax.lax.broadcasted_iota(jnp.int32, (1, Vp), 1)
                      < dim_V).astype(jnp.float32)

        def layer_norm(x, g, b):                       # x: (BN, Vp), f32
            mu = jnp.sum(x, axis=-1, keepdims=True) * (1.0 / dim_V)
            d = (x - mu) * lane_valid
            var = jnp.sum(d * d, axis=-1, keepdims=True) * (1.0 / dim_V)
            return d * jax.lax.rsqrt(var + eps) * g + b

        # ---- fc_q: ONE flat lane-dense matmul, M = Bt*Nq (bf16 in, f32 acc).
        q2 = jnp.dot(qr_ref[...].reshape(BN, Qp).astype(bf16),
                     wq_ref[...].astype(bf16),
                     preferred_element_type=jnp.float32) + bq_ref[...]  # (BN, H*Dp)

        madd = m_ref[...]                      # (Bt, 1, Nk), f32 (-1e9 mask add)
        k_bf = k_ref[...].astype(bf16)         # (Bt, Nk, H*Dp)
        v_bf = v_ref[...].astype(bf16)

        # ---- per-head attention on 128-lane-aligned slices; the merged output
        # is accumulated straight into the lane-dense (BN, Vp) slab via 0/1
        # selection matmuls (f32, exact) -- no lane concat / masked stores.
        o_acc = jnp.zeros((BN, Vp), jnp.float32)
        for h in range(H):
            sl = slice(h * ds_pad, (h + 1) * ds_pad)
            qh = q2[:, sl].reshape(Bt, Nqp, ds_pad)                     # f32
            s = jnp.einsum("bqd,bkd->bqk", qh.astype(bf16), k_bf[:, :, sl],
                           preferred_element_type=jnp.float32) * scale + madd
            s = s - jnp.max(s, axis=-1, keepdims=True)
            e = jnp.exp(s)
            # approx reciprocal on the EUP; attention rows sum to 1 +/- ~1e-3
            a = e * pl.reciprocal(jnp.sum(e, axis=-1, keepdims=True), approx=True)
            pv = jnp.einsum("bqk,bkd->bqd", a.astype(bf16), v_bf[:, :, sl],
                            preferred_element_type=jnp.float32)
            oh = (qh + pv).reshape(BN, ds_pad)          # Q-residual, f32
            o_acc = o_acc + jnp.dot(oh, eye_ref[sl, :],
                                    preferred_element_type=jnp.float32)

        # ---- ln0 -> fc_o + ReLU residual -> ln1, all on the flat (BN, Vp) slab
        o = layer_norm(o_acc, g0_ref[...], b0_ref[...])
        o2 = jnp.dot(o.astype(bf16), wo_ref[...].astype(bf16),
                     preferred_element_type=jnp.float32) + bo_ref[...]
        o = o + jnp.maximum(o2, 0.0)
        o = layer_norm(o, g1_ref[...], b1_ref[...])
        o_ref[...] = o.reshape(Bt, Nqp, Vp)

    return kernel


def attention_core(Qraw, Kd, Vd, madd, params, num_heads):
    B, Nq, dim_Q = Qraw.shape
    Nk = Kd.shape[1]                       # already padded to a multiple of 8
    dim_V = params["wq"].shape[1]
    H = num_heads
    ds = dim_V // H

    Nqp = _round_up(max(Nq, 8), 8)
    Qp = _round_up(dim_Q, 128)
    Dp = _round_up(ds, 128)                # per-head padded (lane-dense) width
    Vp = _round_up(dim_V, 128)
    E = H * Dp

    # ---- wrapper-side lane / sublane padding (XLA glue, done once) ----------
    Q_p = jnp.pad(Qraw, ((0, 0), (0, Nqp - Nq), (0, Qp - dim_Q)))

    def split_pad_heads(x):                # (B, Nk, dim_V) -> (B, Nk, H*Dp)
        x = x.reshape(B, Nk, H, ds)
        x = jnp.pad(x, ((0, 0), (0, 0), (0, 0), (0, Dp - ds)))
        return x.reshape(B, Nk, E)

    K_p = split_pad_heads(Kd)
    V_p = split_pad_heads(Vd)

    wq_p = jnp.pad(params["wq"], ((0, Qp - dim_Q), (0, 0)))       # (Qp, dim_V)
    wq_p = wq_p.reshape(Qp, H, ds)
    wq_p = jnp.pad(wq_p, ((0, 0), (0, 0), (0, Dp - ds))).reshape(Qp, E)
    bq_p = jnp.pad(params["bq"].reshape(H, ds),
                   ((0, 0), (0, Dp - ds))).reshape(1, E)

    # 0/1 head-merge matrix: row h*Dp+d -> column h*ds+d (d < ds); columns past
    # dim_V stay zero so padded output lanes are exactly zero.
    eye_np = np.zeros((E, Vp), np.float32)
    for h in range(H):
        for d in range(ds):
            eye_np[h * Dp + d, h * ds + d] = 1.0
    eye_p = jnp.asarray(eye_np)

    wo_p = jnp.pad(params["wo"], ((0, Vp - dim_V), (0, Vp - dim_V)))
    pad1 = lambda p: jnp.pad(p, (0, Vp - dim_V)).reshape(1, Vp)
    bo_p = pad1(params["bo"])
    g0_p, b0_p = pad1(params["g0"]), pad1(params["b0"])
    g1_p, b1_p = pad1(params["g1"]), pad1(params["b1"])

    n_tc = _num_tensorcores_per_chip()
    bt = _pick_batch_tile(B, n_tc)
    grid = (B // bt,)
    # TODO(synk): on v7x verify in the trace that the "parallel" batch axis is
    # actually sharded across both TensorCores; otherwise switch to a
    # core-parallel tensorcore mesh for this axis.

    kern = _make_attn_kernel(H, dim_V, Dp)
    out = pl.pallas_call(
        kern,
        out_shape=jax.ShapeDtypeStruct((B, Nqp, Vp), jnp.float32),
        grid=grid,
        in_specs=[
            pl.BlockSpec((bt, Nqp, Qp), lambda b: (b, 0, 0)),
            pl.BlockSpec((Qp, E), lambda b: (0, 0)),
            pl.BlockSpec((1, E), lambda b: (0, 0)),
            pl.BlockSpec((bt, Nk, E), lambda b: (b, 0, 0)),
            pl.BlockSpec((bt, Nk, E), lambda b: (b, 0, 0)),
            pl.BlockSpec((bt, 1, Nk), lambda b: (b, 0, 0)),
            pl.BlockSpec((E, Vp), lambda b: (0, 0)),
            pl.BlockSpec((Vp, Vp), lambda b: (0, 0)),
            pl.BlockSpec((1, Vp), lambda b: (0, 0)),
            pl.BlockSpec((1, Vp), lambda b: (0, 0)),
            pl.BlockSpec((1, Vp), lambda b: (0, 0)),
            pl.BlockSpec((1, Vp), lambda b: (0, 0)),
            pl.BlockSpec((1, Vp), lambda b: (0, 0)),
        ],
        out_specs=pl.BlockSpec((bt, Nqp, Vp), lambda b: (b, 0, 0)),
        compiler_params=pltpu.CompilerParams(
            dimension_semantics=("parallel",),
            vmem_limit_bytes=_vmem_limit_bytes(),
        ),
    )(Q_p, wq_p, bq_p, K_p, V_p, madd, eye_p, wo_p,
      bo_p, g0_p, b0_p, g1_p, b1_p)

    return out[:, :Nq, :dim_V]


# ---------------------------------------------------------------------------
# Full Attention_block forward (Pallas kernels + XLA scatter glue)
# ---------------------------------------------------------------------------
def attention_block_forward(params, Q, x_nodes, adj_norm, batch_np, counts_np,
                            num_heads):
    B, Nq, _ = Q.shape
    dim_V = params["wq"].shape[1]

    # fc_k / fc_v GCNConv fused: one xw matmul + one adjacency propagate.
    w_kv = jnp.concatenate([params["wk"], params["wv"]], axis=1)
    b_kv = jnp.concatenate([params["bk"], params["bv"]], axis=0)
    kv = gcn_conv_fused(adj_norm, x_nodes, w_kv, b_kv)
    Kn, Vn = kv[:, :dim_V], kv[:, dim_V:]

    # to_dense_batch (scatter glue, stays in XLA); pad Nmax up to 8 sublanes.
    Nmax = int(counts_np.max())
    Nk = _round_up(max(Nmax, 8), 8)
    pos_np = np.concatenate([np.arange(c) for c in counts_np]).astype(np.int32)
    bidx = jnp.asarray(batch_np.astype(np.int32))
    pidx = jnp.asarray(pos_np)
    Kd = jnp.zeros((B, Nk, dim_V), jnp.float32).at[bidx, pidx].set(Kn)
    Vd = jnp.zeros((B, Nk, dim_V), jnp.float32).at[bidx, pidx].set(Vn)
    mask = jnp.zeros((B, Nk), jnp.float32).at[bidx, pidx].set(1.0)
    madd = ((1.0 - mask) * -1e9).reshape(B, 1, Nk)

    return attention_core(Q, Kd, Vd, madd, params, num_heads)


# ---------------------------------------------------------------------------
# Pure-JAX reference (mirrors the PyTorch forward exactly) for verification
# ---------------------------------------------------------------------------
def forward_ref(params, Q, x_nodes, adj_norm, batch_np, counts_np, num_heads):
    hp = jax.lax.Precision.HIGHEST
    B, Nq, _ = Q.shape
    dim_V = params["wq"].shape[1]
    q = jnp.einsum("bnd,dv->bnv", Q, params["wq"], precision=hp) + params["bq"]
    Kn = adj_norm @ (x_nodes @ params["wk"]) + params["bk"]
    Vn = adj_norm @ (x_nodes @ params["wv"]) + params["bv"]
    Nmax = int(counts_np.max())
    pos_np = np.concatenate([np.arange(c) for c in counts_np]).astype(np.int32)
    bidx = jnp.asarray(batch_np.astype(np.int32))
    pidx = jnp.asarray(pos_np)
    Kd = jnp.zeros((B, Nmax, dim_V), jnp.float32).at[bidx, pidx].set(Kn)
    Vd = jnp.zeros((B, Nmax, dim_V), jnp.float32).at[bidx, pidx].set(Vn)
    mask = jnp.zeros((B, Nmax), jnp.float32).at[bidx, pidx].set(1.0)
    madd = ((1.0 - mask) * -1e9).reshape(B, 1, Nmax)

    H = num_heads
    Q_ = jnp.concatenate(jnp.split(q, H, axis=2), axis=0)
    K_ = jnp.concatenate(jnp.split(Kd, H, axis=2), axis=0)
    V_ = jnp.concatenate(jnp.split(Vd, H, axis=2), axis=0)
    M_ = jnp.concatenate([madd] * H, axis=0)
    score = jnp.einsum("bqd,bkd->bqk", Q_, K_, precision=hp) / math.sqrt(dim_V)
    A = jax.nn.softmax(M_ + score, axis=2)
    O = Q_ + jnp.einsum("bqk,bkd->bqd", A, V_, precision=hp)
    O = jnp.concatenate(jnp.split(O, H, axis=0), axis=2)

    def ln(x, g, b, eps=1e-5):
        mu = jnp.mean(x, axis=-1, keepdims=True)
        var = jnp.mean((x - mu) ** 2, axis=-1, keepdims=True)
        return (x - mu) / jnp.sqrt(var + eps) * g + b

    O = ln(O, params["g0"], params["b0"])
    O = O + jax.nn.relu(jnp.einsum("bnv,vw->bnw", O, params["wo"], precision=hp)
                        + params["bo"])
    O = ln(O, params["g1"], params["b1"])
    return O


# ---------------------------------------------------------------------------
if __name__ == "__main__":
    dim_Q, dim_K, dim_V, num_heads = 16, 8, 32, 4
    B, Nq = 2, 6
    counts_np = np.array([5, 7], dtype=np.int32)          # nodes per graph
    N_nodes = int(counts_np.sum())
    batch_np = np.concatenate([np.full(c, i, dtype=np.int32)
                               for i, c in enumerate(counts_np)])

    key = jax.random.PRNGKey(0)
    keys = jax.random.split(key, 12)
    params = {
        "wq": 0.1 * jax.random.normal(keys[0], (dim_Q, dim_V), jnp.float32),
        "bq": 0.1 * jax.random.normal(keys[1], (dim_V,), jnp.float32),
        "wk": 0.1 * jax.random.normal(keys[2], (dim_K, dim_V), jnp.float32),
        "bk": 0.1 * jax.random.normal(keys[3], (dim_V,), jnp.float32),
        "wv": 0.1 * jax.random.normal(keys[4], (dim_K, dim_V), jnp.float32),
        "bv": 0.1 * jax.random.normal(keys[5], (dim_V,), jnp.float32),
        "wo": 0.1 * jax.random.normal(keys[6], (dim_V, dim_V), jnp.float32),
        "bo": 0.1 * jax.random.normal(keys[7], (dim_V,), jnp.float32),
        "g0": jnp.ones((dim_V,), jnp.float32),             # LayerNorm defaults
        "b0": jnp.zeros((dim_V,), jnp.float32),
        "g1": jnp.ones((dim_V,), jnp.float32),
        "b1": jnp.zeros((dim_V,), jnp.float32),
    }

    Q = jax.random.normal(keys[8], (B, Nq, dim_Q), jnp.float32)
    x_nodes = jax.random.normal(keys[9], (N_nodes, dim_K), jnp.float32)

    # deterministic chain edges inside each graph (undirected), GCN normalization
    adj = np.zeros((N_nodes, N_nodes), dtype=np.float32)
    start = 0
    for c in counts_np:
        for i in range(start, start + c - 1):
            adj[i, i + 1] = 1.0
            adj[i + 1, i] = 1.0
        start += c
    adj_hat = adj + np.eye(N_nodes, dtype=np.float32)      # add self loops
    deg = adj_hat.sum(axis=1)
    dinv = 1.0 / np.sqrt(deg)
    adj_norm = jnp.asarray(dinv[:, None] * adj_hat * dinv[None, :])

    out = attention_block_forward(params, Q, x_nodes, adj_norm, batch_np,
                                  counts_np, num_heads)
    out = jax.block_until_ready(out)

    ref = forward_ref(params, Q, x_nodes, adj_norm, batch_np, counts_np,
                      num_heads)
    # bf16 MXU operands (f32 accumulation) + approx softmax reciprocal give
    # ~1e-2-class deviation from the f32 HIGHEST-precision reference.
    np.testing.assert_allclose(np.asarray(out), np.asarray(ref),
                               rtol=2e-2, atol=2e-2)

    print("KERNEL_OK")
</pallas_src>

<mosaic_0001>
module attributes {stable_mosaic.version = 11 : i64} {
  func.func @_xw_kernel(%arg0: i32, %arg1: memref<16x128xf32, #tpu.memory_space<vmem>>, %arg2: memref<128x128xf32, #tpu.memory_space<vmem>>, %arg3: memref<16x128xbf16, #tpu.memory_space<vmem>>) attributes {dimension_semantics = [#tpu.dimension_semantics<arbitrary>], iteration_bounds = array<i64: 1>, scalar_prefetch = 0 : i64, scratch_operands = 0 : i64, tpu.core_type = #tpu.core_type<tc>, window_params = [{pipeline_mode = #tpu.pipeline_mode<synchronous>, transform_indices = @transform_0, window_bounds = array<i64: 16, 128>}, {pipeline_mode = #tpu.pipeline_mode<synchronous>, transform_indices = @transform_1, window_bounds = array<i64: 128, 128>}, {pipeline_mode = #tpu.pipeline_mode<synchronous>, transform_indices = @transform_2, window_bounds = array<i64: 16, 128>}]} {
    %c0 = arith.constant 0 : index
    %c0_0 = arith.constant 0 : index
    %0 = vector.load %arg1[%c0, %c0_0] : memref<16x128xf32, #tpu.memory_space<vmem>>, vector<16x128xf32>
    %1 = arith.truncf %0 : vector<16x128xf32> to vector<16x128xbf16>
    %c0_1 = arith.constant 0 : index
    %c0_2 = arith.constant 0 : index
    %2 = vector.load %arg2[%c0_1, %c0_2] : memref<128x128xf32, #tpu.memory_space<vmem>>, vector<128x128xf32>
    %3 = arith.truncf %2 : vector<128x128xf32> to vector<128x128xbf16>
    %cst = arith.constant dense<0.000000e+00> : vector<16x128xf32>
    %4 = tpu.matmul %1, %3, %cst {dimension_numbers = #tpu.dot_dimension_numbers<[1], [0], [0], [1], [0, 0, 1, 1], [], []>} : vector<16x128xbf16>, vector<128x128xbf16>, vector<16x128xf32> -> vector<16x128xf32>
    %5 = arith.truncf %4 : vector<16x128xf32> to vector<16x128xbf16>
    %c0_3 = arith.constant 0 : index
    %c0_4 = arith.constant 0 : index
    %6 = vector.load %arg3[%c0_3, %c0_4] : memref<16x128xbf16, #tpu.memory_space<vmem>>, vector<16x128xbf16>
    tpu.vector_store %arg3[%c0_3, %c0_4], %5 {strides = array<i32>} : memref<16x128xbf16, #tpu.memory_space<vmem>>, vector<16x128xbf16>,
    return
  }
  func.func @transform_0(%arg0: i32) -> (i32, i32) {
    %c0_i32 = arith.constant 0 : i32
    %c0_i32_0 = arith.constant 0 : i32
    %c0_i32_1 = arith.constant 0 : i32
    return %c0_i32, %c0_i32_0 : i32, i32
  }
  func.func @transform_1(%arg0: i32) -> (i32, i32) {
    %c0_i32 = arith.constant 0 : i32
    %c0_i32_0 = arith.constant 0 : i32
    %c0_i32_1 = arith.constant 0 : i32
    return %c0_i32, %c0_i32_0 : i32, i32
  }
  func.func @transform_2(%arg0: i32) -> (i32, i32) {
    %c0_i32 = arith.constant 0 : i32
    %c0_i32_0 = arith.constant 0 : i32
    %c0_i32_1 = arith.constant 0 : i32
    return %c0_i32, %c0_i32_0 : i32, i32
  }
}

</mosaic_0001>

<bundles_post_ra>
// kernel: tpu_custom_call.1
= control target key start
LH: loop header
LB: loop body
LE: loop exit
PB: predicated region body
PF: predicated region fallthrough
CT: control target
= control target key end

     0   :  { %7 = vsyncpa [#allocation3], 0  ;;  %s230_s0 = inlined_call_operand.hbm [shape: f32[16,128], index: 0, kind: input, shape index: {}]   ;;  %s231_s1 = inlined_call_operand.hbm [shape: f32[128,128], index: 1, kind: input, shape index: {}]   ;;  %s232_s2 = inlined_call_operand.hbm [shape: bf16[16,128], index: 2, kind: output, shape index: {}]  }
   0x1   :  { %8 = vsyncpa [#allocation6], 0 }
   0x2   :  { %9 = vsyncpa [#allocation4], 0  ;;  %s14_s11 = sshll.u32 %s230_s0, 4  ;;  %s199_s12 = smov [#allocation2]   ;;  %s15_s11 = int_to_ptr.hbm [resolvable:$true] %s14_s11 }
   0x3   :  { %s16_s13 = sshll.u32 %s199_s12, 4  ;;  %s27_s16 = sshll.u32 %s231_s1, 4  ;;  %s17_s13 = int_to_ptr.vmem [resolvable:$true] %s16_s13  ;;  %s28_s16 = int_to_ptr.hbm [resolvable:$true] %s27_s16 }
   0x4   :  { %s200_s17 = smov 128   ;;  %s201_s18 = smov 8  }
   0x5   :  { %22 = dma.hbm_to_vmem [thread:$0]  %s15_s11, 256, %s17_s13, [#allocation3], %s200_s17, %s200_s17, %s201_s18  }
   0x6   :  { %s202_s19 = smov [#allocation5]  }
   0x7   :  { %s29_s20 = sshll.u32 %s202_s19, 4  ;;  %s30_s20 = int_to_ptr.vmem [resolvable:$true] %s29_s20 }
   0x8   :  { %35 = dma.hbm_to_vmem [thread:$0]  %s28_s16, 2048, %s30_s20, [#allocation6], %s200_s17, %s200_s17, %s201_s18  }
   0x9   :  { %193 = dma.done.wait [#allocation3], 256  }
   0xa   :  { %194 = vsyncadd [#allocation3], 4294967040 }
   0xb   :  { %195 = dma.done.wait [#allocation6], 2048  }
   0xc   :  { %196 = vsyncadd [#allocation6], 4294965248  ;;  %v61_v0 = vld [vmem:[#allocation5 + $0x70] sm:$0xff]  ;;  %v62_v1 = vld [vmem:[#allocation5 + $0x78] sm:$0xff]  ;;  %s203_s0 = smov [#allocation7]   ;;  %s95_s23 = sshll.u32 %s232_s2, 4  ;;  %s96_s23 = int_to_ptr.hbm [resolvable:$true] %s95_s23 }
   0xd   :  { %v59_v2 = vld [vmem:[#allocation5 + $0x60] sm:$0xff]  ;;  %v70_v3 = vpack.c.bf16 %v62_v1, %v61_v0  ;;  %v60_v4 = vld [vmem:[#allocation5 + $0x68] sm:$0xff]  ;;  %v57_v6 = vld [vmem:[#allocation5 + $0x50] sm:$0xff]  ;;  %s93_s1 = sshll.u32 %s203_s0, 4  ;;  %s204_s24 = smov 64   ;;  %s94_s1 = int_to_ptr.vmem [resolvable:$true] %s93_s1 }
   0xe   :  { %v69_v5 = vpack.c.bf16 %v60_v4, %v59_v2  ;;  %v58_v7 = vld [vmem:[#allocation5 + $0x58] sm:$0xff]  ;;  %v55_v9 = vld [vmem:[#allocation5 + $0x40] sm:$0xff]  ;;  %v56_v10 = vld [vmem:[#allocation5 + $0x48] sm:$0xff]  ;;  %s205_s25 = smov 4  }
   0xf   :  { %71 = vmatpush.bf16.msra.mxu0 %v70_v3  ;;  %v68_v8 = vpack.c.bf16 %v58_v7, %v57_v6  ;;  %v67_v11 = vpack.c.bf16 %v56_v10, %v55_v9  ;;  %v53_v12 = vld [vmem:[#allocation5 + $0x30] sm:$0xff]  ;;  %v54_v13 = vld [vmem:[#allocation5 + $0x38] sm:$0xff]  ;;  %v51_v15 = vld [vmem:[#allocation5 + $0x20] sm:$0xff] }
  0x10   :  { %v66_v14 = vpack.c.bf16 %v54_v13, %v53_v12  ;;  %v52_v16 = vld [vmem:[#allocation5 + $0x28] sm:$0xff]  ;;  %v49_v18 = vld [vmem:[#allocation5 + $0x10] sm:$0xff]  ;;  %v50_v19 = vld [vmem:[#allocation5 + $0x18] sm:$0xff] }
  0x11   :  { %v65_v17 = vpack.c.bf16 %v52_v16, %v51_v15  ;;  %v64_v20 = vpack.c.bf16 %v50_v19, %v49_v18  ;;  %v47_v21 = vld [vmem:[#allocation5] sm:$0xff]  ;;  %v48_v22 = vld [vmem:[#allocation5 + $0x8] sm:$0xff]  ;;  %v44_v24 = vld [vmem:[#allocation2] sm:$0xff] }
  0x12   :  { %v63_v23 = vpack.c.bf16 %v48_v22, %v47_v21  ;;  %v45_v25 = vld [vmem:[#allocation2 + $0x8] sm:$0xff] }
  0x13   :  { %72 = vmatpush.bf16.msra.mxu0 %v69_v5  ;;  %v46_v26 = vpack.c.bf16 %v45_v25, %v44_v24 }
  0x17   :  { %73 = vmatpush.bf16.msra.mxu0 %v68_v8 }
  0x1b   :  { %74 = vmatpush.bf16.msra.mxu0 %v67_v11 }
  0x1f   :  { %75 = vmatpush.bf16.msra.mxu0 %v66_v14 }
  0x23   :  { %76 = vmatpush.bf16.msra.mxu0 %v65_v17 }
  0x27   :  { %77 = vmatpush.bf16.msra.mxu0 %v64_v20 }
  0x2b   :  { %78 = vmatpush.bf16.msra.mxu0 %v63_v23 }
  0x2e   :  { %79 = vmatmul.bf16.vlgmr.msra.gmra.mxu0 %v46_v26 }
  0xab   :  { %v80_v27 = vpop.f32.mrf.mxu0 }
  0xb3   :  { %v82_v28 = vpop.f32.mrf.mxu0 }
  0xb4   :  { %v112_v29 = vpack.c.bf16 %v82_v28, %v80_v27 }
  0xb6   :  { %113 = vst [vmem:[#allocation7] sm:$0xff] %v112_v29  }
  0xb7   :  { %101 = dma.vmem_to_hbm [thread:$0]  %s94_s1, 128, %s96_s23, [#allocation4], %s204_s24, %s204_s24, %s205_s25  }
  0xb8   :  { %197 = dma.done.wait [#allocation4], 128  }
  0xb9   :  { %198 = vsyncadd [#allocation4], 4294967168 }
  0xba   :  { %106 = vsyncpa [#allocation3], 1 }
  0xbb   :  { %107 = vsyncpa [#allocation6], 1 }
  0xbc   :  { %108 = vsyncpa [#allocation4], 1 }

</bundles_post_ra>
